<compile_context>
chip_gen: v7x
topology: tpu7x:2x2x1
jax: 0.10.0
libtpu: 0.0.40
codegen_flags: <defaults>
</compile_context>

<pallas_src>
import jax
import jax.numpy as jnp
from jax import lax
from jax.experimental import pallas as pl
from jax.experimental.pallas import tpu as pltpu

KSIZE = 3          # kernel_size=3 -> padding=1
PAD = 1


def _tpu_generation():
    """Best-effort TPU generation (5 / 6 / 7) from the device kind string."""
    try:
        kind = jax.devices()[0].device_kind.lower()
    except Exception:
        return 6
    for g in (7, 6, 5, 4):
        if f"v{g}" in kind:
            return g
    return 6


def _largest_divisor_leq(n, cap):
    best = 1
    for d in range(1, min(n, cap) + 1):
        if n % d == 0:
            best = d
    return best


def _pick_channel_chunk(C, dtype):
    # Full sublane tile per chunk: 8 rows f32, 16 bf16, 32 int8.
    packing = {4: 8, 2: 16, 1: 32}.get(jnp.dtype(dtype).itemsize, 8)
    if C <= packing:
        return C
    if C % packing == 0:
        return packing
    return _largest_divisor_leq(C, packing)


def _pick_batch_tile(B, bytes_per_image, gen):
    if gen >= 7:
        # 64 MiB VMEM (32 MiB default scoped), 2 TensorCores: keep blocks small
        # enough that 2x(in+out) double-buffering fits, and >= 2 grid steps.
        target_bytes = 6 << 20
        min_steps = min(B, 2)
    else:
        # v5e / v6e: 128 MiB VMEM, single TensorCore -> biggest block that fits.
        target_bytes = 12 << 20
        min_steps = 1
    max_bt = max(1, B // max(1, min_steps))
    cands = [bt for bt in range(1, max_bt + 1)
             if B % bt == 0 and bt * bytes_per_image <= target_bytes]
    if not cands:
        return 1
    # Prefer multiples of 8 so the (Bt, H*W) f32 map path fills vreg sublanes.
    mult8 = [bt for bt in cands if bt % 8 == 0]
    return max(mult8) if mult8 else max(cands)


def spatial_attention(x, conv_weight):
    """x: (B, C, H, W); conv_weight: (1, 2, 3, 3) from nn.Conv2d(2,1,3,padding=1,bias=False)."""
    B, C, H, W = x.shape
    HW = H * W
    gen = _tpu_generation()

    x_flat = x.reshape(B, C, HW)                             # lane-dense last dim
    w_flat = conv_weight.reshape(-1).astype(jnp.float32)     # (18,) -> SMEM

    bytes_per_image = C * HW * x.dtype.itemsize
    Bt = _pick_batch_tile(B, bytes_per_image, gen)
    CCH = _pick_channel_chunk(C, x.dtype)
    inv_c = 1.0 / C

    # Bulk x*(1+y) pass dtype: native f32; native bf16 on v6e/v7x (bf16 VALU),
    # keep the f32 upcast on v5e (no bf16 VALU).
    if x.dtype == jnp.bfloat16 and gen < 6:
        bulk_dtype = jnp.float32
    else:
        bulk_dtype = x.dtype

    # 8 combined (row AND col) boundary masks, one per non-center tap (u, v).
    # tap[p] = map[p + u*W + v]; every wrapped / cross-row lane is exactly the
    # set zeroed by its tap mask (a select, so no stale-value hazard).
    pos = jnp.arange(HW, dtype=jnp.int32)
    row = pos // W
    col = pos % W
    ones = jnp.ones((HW,), jnp.bool_)
    row_ok = {-1: row >= 1, 0: ones, 1: row <= H - 2}
    col_ok = {-1: col >= 1, 0: ones, 1: col <= W - 2}
    tap_offsets = [(u, v) for u in (-1, 0, 1) for v in (-1, 0, 1) if (u, v) != (0, 0)]
    masks = jnp.stack([jnp.logical_and(row_ok[u], col_ok[v])
                       for (u, v) in tap_offsets]).astype(jnp.float32)   # (8, HW)
    # TODO(synk): generate these masks in-kernel via broadcasted_iota (drops the
    # tiny masks input) once vector int remainder is guaranteed on all targets.

    def kernel(w_ref, masks_ref, x_ref, o_ref):
        # w_ref:     (18,) f32 SMEM    flattened OIHW conv weight
        # masks_ref: (8, HW) f32 VMEM  combined per-tap boundary masks
        # x_ref:     (Bt, C, HW) VMEM  input block (lane-dense)
        # o_ref:     (Bt, C, HW) VMEM  output block

        # --- hoisted conv-weight scalars (18 SMEM reads, once per grid step) ---
        w = [w_ref[i] for i in range(18)]

        # --- channel mean & max over the whole batch tile: (Bt, HW) f32 ---
        xc0 = x_ref[:, 0:CCH, :].astype(jnp.float32)
        ssum = jnp.sum(xc0, axis=1)
        smax = jnp.max(xc0, axis=1)
        for c0 in range(CCH, C, CCH):
            xc = x_ref[:, c0:c0 + CCH, :].astype(jnp.float32)
            ssum = ssum + jnp.sum(xc, axis=1)
            smax = jnp.maximum(smax, jnp.max(xc, axis=1))
        avg = ssum * inv_c                                   # conv input ch 0
        mx = smax                                            # conv input ch 1

        # --- 3x3 conv (2 -> 1, zero padding) via lane-rolled taps (XLU) ---
        conv = w[4] * avg + w[13] * mx                       # center tap: no mask
        for k, (u, v) in enumerate(tap_offsets):
            off = u * W + v
            shift = (-off) % HW                              # tap[p] = map[p + off]
            tap_a = pltpu.roll(avg, shift=shift, axis=1)
            tap_m = pltpu.roll(mx, shift=shift, axis=1)
            w_a = w[(u + 1) * 3 + (v + 1)]                   # channel 0 = avg
            w_m = w[9 + (u + 1) * 3 + (v + 1)]               # channel 1 = max
            contrib = w_a * tap_a + w_m * tap_m
            mask = masks_ref[k:k + 1, :] > 0.5               # (1, HW) bool
            conv = conv + jnp.where(mask, contrib, 0.0)

        # --- fused residual: out = x * (1 + sigmoid(conv)) ---
        y1 = (1.0 + jax.nn.sigmoid(conv)).astype(bulk_dtype)     # (Bt, HW)
        y1b = jnp.broadcast_to(y1[:, None, :], (Bt, CCH, HW))    # hoisted broadcast

        for c0 in range(0, C, CCH):
            xc = x_ref[:, c0:c0 + CCH, :].astype(bulk_dtype)
            o_ref[:, c0:c0 + CCH, :] = (xc * y1b).astype(o_ref.dtype)

    block_bytes = Bt * C * HW * x.dtype.itemsize
    # ~4x block for in+out double-buffering, plus masks/headroom; cap per gen.
    vmem_cap = (40 << 20) if gen >= 7 else (96 << 20)
    vmem_limit = int(min(vmem_cap, max(16 << 20, 5 * block_bytes)))

    out_flat = pl.pallas_call(
        kernel,
        out_shape=jax.ShapeDtypeStruct((B, C, HW), x.dtype),
        grid_spec=pltpu.PrefetchScalarGridSpec(
            num_scalar_prefetch=0,
            grid=(B // Bt,),
            in_specs=[
                pl.BlockSpec(memory_space=pltpu.MemorySpace.SMEM),   # conv weights
                pl.BlockSpec((8, HW), lambda i: (0, 0)),             # tap masks
                pl.BlockSpec((Bt, C, HW), lambda i: (i, 0, 0)),      # x (lane-dense)
            ],
            out_specs=pl.BlockSpec((Bt, C, HW), lambda i: (i, 0, 0)),
        ),
        compiler_params=pltpu.CompilerParams(
            dimension_semantics=("parallel",),
            vmem_limit_bytes=vmem_limit,
        ),
    )(w_flat, masks, x_flat)

    return out_flat.reshape(B, C, H, W)


def _reference(x, conv_weight):
    # Pure-JAX reference of the PyTorch forward.
    avg = jnp.mean(x, axis=1, keepdims=True)
    mx = jnp.max(x, axis=1, keepdims=True)
    y = jnp.concatenate([avg, mx], axis=1)                   # (B, 2, H, W)
    y = lax.conv_general_dilated(
        y, conv_weight, window_strides=(1, 1), padding=((PAD, PAD), (PAD, PAD)),
        dimension_numbers=("NCHW", "OIHW", "NCHW"))
    y = jax.nn.sigmoid(y)
    return x * y + x


if __name__ == "__main__":
    key = jax.random.PRNGKey(0)
    k_x, k_w = jax.random.split(key)

    B, C, H, W = 2, 4, 16, 16
    x = jax.random.normal(k_x, (B, C, H, W), dtype=jnp.float32)
    # Deterministic synthetic weight (nn.Conv2d(2, 1, 3, padding=1, bias=False)).
    conv_weight = jax.random.normal(k_w, (1, 2, KSIZE, KSIZE), dtype=jnp.float32) * 0.1

    out = spatial_attention(x, conv_weight)
    out = jax.block_until_ready(out)

    ref = _reference(x, conv_weight)
    assert out.shape == x.shape
    assert jnp.allclose(out, ref, atol=1e-5, rtol=1e-5), float(jnp.max(jnp.abs(out - ref)))

    print("KERNEL_OK")
</pallas_src>

<mosaic_0001>
module attributes {stable_mosaic.version = 11 : i64} {
  func.func @kernel(%arg0: i32, %arg1: memref<18xf32, #tpu.memory_space<smem>>, %arg2: memref<8x256xf32, #tpu.memory_space<vmem>>, %arg3: memref<2x4x256xf32, #tpu.memory_space<vmem>>, %arg4: memref<2x4x256xf32, #tpu.memory_space<vmem>>) attributes {dimension_semantics = [#tpu.dimension_semantics<parallel>], iteration_bounds = array<i64: 1>, scalar_prefetch = 0 : i64, scratch_operands = 0 : i64, tpu.core_type = #tpu.core_type<tc>, window_params = [{transform_indices = @transform_0, window_bounds = array<i64: 18>}, {pipeline_mode = #tpu.pipeline_mode<synchronous>, transform_indices = @transform_1, window_bounds = array<i64: 8, 256>}, {transform_indices = @transform_2, window_bounds = array<i64: 2, 4, 256>}, {transform_indices = @transform_3, window_bounds = array<i64: 2, 4, 256>}]} {
    %c0 = arith.constant 0 : index
    %0 = memref.load %arg1[%c0] : memref<18xf32, #tpu.memory_space<smem>>
    %c1 = arith.constant 1 : index
    %1 = memref.load %arg1[%c1] : memref<18xf32, #tpu.memory_space<smem>>
    %c2 = arith.constant 2 : index
    %2 = memref.load %arg1[%c2] : memref<18xf32, #tpu.memory_space<smem>>
    %c3 = arith.constant 3 : index
    %3 = memref.load %arg1[%c3] : memref<18xf32, #tpu.memory_space<smem>>
    %c4 = arith.constant 4 : index
    %4 = memref.load %arg1[%c4] : memref<18xf32, #tpu.memory_space<smem>>
    %c5 = arith.constant 5 : index
    %5 = memref.load %arg1[%c5] : memref<18xf32, #tpu.memory_space<smem>>
    %c6 = arith.constant 6 : index
    %6 = memref.load %arg1[%c6] : memref<18xf32, #tpu.memory_space<smem>>
    %c7 = arith.constant 7 : index
    %7 = memref.load %arg1[%c7] : memref<18xf32, #tpu.memory_space<smem>>
    %c8 = arith.constant 8 : index
    %8 = memref.load %arg1[%c8] : memref<18xf32, #tpu.memory_space<smem>>
    %c9 = arith.constant 9 : index
    %9 = memref.load %arg1[%c9] : memref<18xf32, #tpu.memory_space<smem>>
    %c10 = arith.constant 10 : index
    %10 = memref.load %arg1[%c10] : memref<18xf32, #tpu.memory_space<smem>>
    %c11 = arith.constant 11 : index
    %11 = memref.load %arg1[%c11] : memref<18xf32, #tpu.memory_space<smem>>
    %c12 = arith.constant 12 : index
    %12 = memref.load %arg1[%c12] : memref<18xf32, #tpu.memory_space<smem>>
    %c13 = arith.constant 13 : index
    %13 = memref.load %arg1[%c13] : memref<18xf32, #tpu.memory_space<smem>>
    %c14 = arith.constant 14 : index
    %14 = memref.load %arg1[%c14] : memref<18xf32, #tpu.memory_space<smem>>
    %c15 = arith.constant 15 : index
    %15 = memref.load %arg1[%c15] : memref<18xf32, #tpu.memory_space<smem>>
    %c16 = arith.constant 16 : index
    %16 = memref.load %arg1[%c16] : memref<18xf32, #tpu.memory_space<smem>>
    %c17 = arith.constant 17 : index
    %17 = memref.load %arg1[%c17] : memref<18xf32, #tpu.memory_space<smem>>
    %c0_0 = arith.constant 0 : index
    %c0_1 = arith.constant 0 : index
    %c0_2 = arith.constant 0 : index
    %18 = vector.load %arg3[%c0_0, %c0_1, %c0_2] : memref<2x4x256xf32, #tpu.memory_space<vmem>>, vector<2x4x256xf32>
    %cst = arith.constant dense<0.000000e+00> : vector<2x256xf32>
    %19 = vector.multi_reduction <add>, %18, %cst [1] : vector<2x4x256xf32> to vector<2x256xf32>
    %cst_3 = arith.constant dense<0xFF800000> : vector<2x256xf32>
    %20 = vector.multi_reduction <maximumf>, %18, %cst_3 [1] : vector<2x4x256xf32> to vector<2x256xf32>
    %cst_4 = arith.constant 2.500000e-01 : f32
    %21 = vector.broadcast %cst_4 : f32 to vector<2x256xf32>
    %22 = arith.mulf %19, %21 : vector<2x256xf32>
    %23 = vector.broadcast %4 : f32 to vector<2x256xf32>
    %24 = arith.mulf %23, %22 : vector<2x256xf32>
    %25 = vector.broadcast %13 : f32 to vector<2x256xf32>
    %26 = arith.mulf %25, %20 : vector<2x256xf32>
    %27 = arith.addf %24, %26 : vector<2x256xf32>
    %c17_i32 = arith.constant 17 : i32
    %28 = tpu.dynamic_rotate %22 by %c17_i32 dim 1 : vector<2x256xf32>, i32 -> vector<2x256xf32>
    %c17_i32_5 = arith.constant 17 : i32
    %29 = tpu.dynamic_rotate %20 by %c17_i32_5 dim 1 : vector<2x256xf32>, i32 -> vector<2x256xf32>
    %30 = vector.broadcast %0 : f32 to vector<2x256xf32>
    %31 = arith.mulf %30, %28 : vector<2x256xf32>
    %32 = vector.broadcast %9 : f32 to vector<2x256xf32>
    %33 = arith.mulf %32, %29 : vector<2x256xf32>
    %34 = arith.addf %31, %33 : vector<2x256xf32>
    %c0_6 = arith.constant 0 : index
    %c0_7 = arith.constant 0 : index
    %35 = vector.load %arg2[%c0_6, %c0_7] : memref<8x256xf32, #tpu.memory_space<vmem>>, vector<1x256xf32>
    %cst_8 = arith.constant 5.000000e-01 : f32
    %36 = vector.broadcast %cst_8 : f32 to vector<1x256xf32>
    %37 = arith.cmpf ogt, %35, %36 : vector<1x256xf32>
    %cst_9 = arith.constant 0.000000e+00 : f32
    %38 = vector.shape_cast %37 : vector<1x256xi1> to vector<1x256xi1>
    %39 = vector.broadcast %38 : vector<1x256xi1> to vector<2x256xi1>
    %40 = vector.broadcast %cst_9 : f32 to vector<2x256xf32>
    %41 = arith.select %39, %34, %40 : vector<2x256xi1>, vector<2x256xf32>
    %42 = arith.addf %27, %41 : vector<2x256xf32>
    %c16_i32 = arith.constant 16 : i32
    %43 = tpu.dynamic_rotate %22 by %c16_i32 dim 1 : vector<2x256xf32>, i32 -> vector<2x256xf32>
    %c16_i32_10 = arith.constant 16 : i32
    %44 = tpu.dynamic_rotate %20 by %c16_i32_10 dim 1 : vector<2x256xf32>, i32 -> vector<2x256xf32>
    %45 = vector.broadcast %1 : f32 to vector<2x256xf32>
    %46 = arith.mulf %45, %43 : vector<2x256xf32>
    %47 = vector.broadcast %10 : f32 to vector<2x256xf32>
    %48 = arith.mulf %47, %44 : vector<2x256xf32>
    %49 = arith.addf %46, %48 : vector<2x256xf32>
    %c1_11 = arith.constant 1 : index
    %c0_12 = arith.constant 0 : index
    %50 = vector.load %arg2[%c1_11, %c0_12] : memref<8x256xf32, #tpu.memory_space<vmem>>, vector<1x256xf32>
    %cst_13 = arith.constant 5.000000e-01 : f32
    %51 = vector.broadcast %cst_13 : f32 to vector<1x256xf32>
    %52 = arith.cmpf ogt, %50, %51 : vector<1x256xf32>
    %cst_14 = arith.constant 0.000000e+00 : f32
    %53 = vector.shape_cast %52 : vector<1x256xi1> to vector<1x256xi1>
    %54 = vector.broadcast %53 : vector<1x256xi1> to vector<2x256xi1>
    %55 = vector.broadcast %cst_14 : f32 to vector<2x256xf32>
    %56 = arith.select %54, %49, %55 : vector<2x256xi1>, vector<2x256xf32>
    %57 = arith.addf %42, %56 : vector<2x256xf32>
    %c15_i32 = arith.constant 15 : i32
    %58 = tpu.dynamic_rotate %22 by %c15_i32 dim 1 : vector<2x256xf32>, i32 -> vector<2x256xf32>
    %c15_i32_15 = arith.constant 15 : i32
    %59 = tpu.dynamic_rotate %20 by %c15_i32_15 dim 1 : vector<2x256xf32>, i32 -> vector<2x256xf32>
    %60 = vector.broadcast %2 : f32 to vector<2x256xf32>
    %61 = arith.mulf %60, %58 : vector<2x256xf32>
    %62 = vector.broadcast %11 : f32 to vector<2x256xf32>
    %63 = arith.mulf %62, %59 : vector<2x256xf32>
    %64 = arith.addf %61, %63 : vector<2x256xf32>
    %c2_16 = arith.constant 2 : index
    %c0_17 = arith.constant 0 : index
    %65 = vector.load %arg2[%c2_16, %c0_17] : memref<8x256xf32, #tpu.memory_space<vmem>>, vector<1x256xf32>
    %cst_18 = arith.constant 5.000000e-01 : f32
    %66 = vector.broadcast %cst_18 : f32 to vector<1x256xf32>
    %67 = arith.cmpf ogt, %65, %66 : vector<1x256xf32>
    %cst_19 = arith.constant 0.000000e+00 : f32
    %68 = vector.shape_cast %67 : vector<1x256xi1> to vector<1x256xi1>
    %69 = vector.broadcast %68 : vector<1x256xi1> to vector<2x256xi1>
    %70 = vector.broadcast %cst_19 : f32 to vector<2x256xf32>
    %71 = arith.select %69, %64, %70 : vector<2x256xi1>, vector<2x256xf32>
    %72 = arith.addf %57, %71 : vector<2x256xf32>
    %c1_i32 = arith.constant 1 : i32
    %73 = tpu.dynamic_rotate %22 by %c1_i32 dim 1 : vector<2x256xf32>, i32 -> vector<2x256xf32>
    %c1_i32_20 = arith.constant 1 : i32
    %74 = tpu.dynamic_rotate %20 by %c1_i32_20 dim 1 : vector<2x256xf32>, i32 -> vector<2x256xf32>
    %75 = vector.broadcast %3 : f32 to vector<2x256xf32>
    %76 = arith.mulf %75, %73 : vector<2x256xf32>
    %77 = vector.broadcast %12 : f32 to vector<2x256xf32>
    %78 = arith.mulf %77, %74 : vector<2x256xf32>
    %79 = arith.addf %76, %78 : vector<2x256xf32>
    %c3_21 = arith.constant 3 : index
    %c0_22 = arith.constant 0 : index
    %80 = vector.load %arg2[%c3_21, %c0_22] : memref<8x256xf32, #tpu.memory_space<vmem>>, vector<1x256xf32>
    %cst_23 = arith.constant 5.000000e-01 : f32
    %81 = vector.broadcast %cst_23 : f32 to vector<1x256xf32>
    %82 = arith.cmpf ogt, %80, %81 : vector<1x256xf32>
    %cst_24 = arith.constant 0.000000e+00 : f32
    %83 = vector.shape_cast %82 : vector<1x256xi1> to vector<1x256xi1>
    %84 = vector.broadcast %83 : vector<1x256xi1> to vector<2x256xi1>
    %85 = vector.broadcast %cst_24 : f32 to vector<2x256xf32>
    %86 = arith.select %84, %79, %85 : vector<2x256xi1>, vector<2x256xf32>
    %87 = arith.addf %72, %86 : vector<2x256xf32>
    %c255_i32 = arith.constant 255 : i32
    %88 = tpu.dynamic_rotate %22 by %c255_i32 dim 1 : vector<2x256xf32>, i32 -> vector<2x256xf32>
    %c255_i32_25 = arith.constant 255 : i32
    %89 = tpu.dynamic_rotate %20 by %c255_i32_25 dim 1 : vector<2x256xf32>, i32 -> vector<2x256xf32>
    %90 = vector.broadcast %5 : f32 to vector<2x256xf32>
    %91 = arith.mulf %90, %88 : vector<2x256xf32>
    %92 = vector.broadcast %14 : f32 to vector<2x256xf32>
    %93 = arith.mulf %92, %89 : vector<2x256xf32>
    %94 = arith.addf %91, %93 : vector<2x256xf32>
    %c4_26 = arith.constant 4 : index
    %c0_27 = arith.constant 0 : index
    %95 = vector.load %arg2[%c4_26, %c0_27] : memref<8x256xf32, #tpu.memory_space<vmem>>, vector<1x256xf32>
    %cst_28 = arith.constant 5.000000e-01 : f32
    %96 = vector.broadcast %cst_28 : f32 to vector<1x256xf32>
    %97 = arith.cmpf ogt, %95, %96 : vector<1x256xf32>
    %cst_29 = arith.constant 0.000000e+00 : f32
    %98 = vector.shape_cast %97 : vector<1x256xi1> to vector<1x256xi1>
    %99 = vector.broadcast %98 : vector<1x256xi1> to vector<2x256xi1>
    %100 = vector.broadcast %cst_29 : f32 to vector<2x256xf32>
    %101 = arith.select %99, %94, %100 : vector<2x256xi1>, vector<2x256xf32>
    %102 = arith.addf %87, %101 : vector<2x256xf32>
    %c241_i32 = arith.constant 241 : i32
    %103 = tpu.dynamic_rotate %22 by %c241_i32 dim 1 : vector<2x256xf32>, i32 -> vector<2x256xf32>
    %c241_i32_30 = arith.constant 241 : i32
    %104 = tpu.dynamic_rotate %20 by %c241_i32_30 dim 1 : vector<2x256xf32>, i32 -> vector<2x256xf32>
    %105 = vector.broadcast %6 : f32 to vector<2x256xf32>
    %106 = arith.mulf %105, %103 : vector<2x256xf32>
    %107 = vector.broadcast %15 : f32 to vector<2x256xf32>
    %108 = arith.mulf %107, %104 : vector<2x256xf32>
    %109 = arith.addf %106, %108 : vector<2x256xf32>
    %c5_31 = arith.constant 5 : index
    %c0_32 = arith.constant 0 : index
    %110 = vector.load %arg2[%c5_31, %c0_32] : memref<8x256xf32, #tpu.memory_space<vmem>>, vector<1x256xf32>
    %cst_33 = arith.constant 5.000000e-01 : f32
    %111 = vector.broadcast %cst_33 : f32 to vector<1x256xf32>
    %112 = arith.cmpf ogt, %110, %111 : vector<1x256xf32>
    %cst_34 = arith.constant 0.000000e+00 : f32
    %113 = vector.shape_cast %112 : vector<1x256xi1> to vector<1x256xi1>
    %114 = vector.broadcast %113 : vector<1x256xi1> to vector<2x256xi1>
    %115 = vector.broadcast %cst_34 : f32 to vector<2x256xf32>
    %116 = arith.select %114, %109, %115 : vector<2x256xi1>, vector<2x256xf32>
    %117 = arith.addf %102, %116 : vector<2x256xf32>
    %c240_i32 = arith.constant 240 : i32
    %118 = tpu.dynamic_rotate %22 by %c240_i32 dim 1 : vector<2x256xf32>, i32 -> vector<2x256xf32>
    %c240_i32_35 = arith.constant 240 : i32
    %119 = tpu.dynamic_rotate %20 by %c240_i32_35 dim 1 : vector<2x256xf32>, i32 -> vector<2x256xf32>
    %120 = vector.broadcast %7 : f32 to vector<2x256xf32>
    %121 = arith.mulf %120, %118 : vector<2x256xf32>
    %122 = vector.broadcast %16 : f32 to vector<2x256xf32>
    %123 = arith.mulf %122, %119 : vector<2x256xf32>
    %124 = arith.addf %121, %123 : vector<2x256xf32>
    %c6_36 = arith.constant 6 : index
    %c0_37 = arith.constant 0 : index
    %125 = vector.load %arg2[%c6_36, %c0_37] : memref<8x256xf32, #tpu.memory_space<vmem>>, vector<1x256xf32>
    %cst_38 = arith.constant 5.000000e-01 : f32
    %126 = vector.broadcast %cst_38 : f32 to vector<1x256xf32>
    %127 = arith.cmpf ogt, %125, %126 : vector<1x256xf32>
    %cst_39 = arith.constant 0.000000e+00 : f32
    %128 = vector.shape_cast %127 : vector<1x256xi1> to vector<1x256xi1>
    %129 = vector.broadcast %128 : vector<1x256xi1> to vector<2x256xi1>
    %130 = vector.broadcast %cst_39 : f32 to vector<2x256xf32>
    %131 = arith.select %129, %124, %130 : vector<2x256xi1>, vector<2x256xf32>
    %132 = arith.addf %117, %131 : vector<2x256xf32>
    %c239_i32 = arith.constant 239 : i32
    %133 = tpu.dynamic_rotate %22 by %c239_i32 dim 1 : vector<2x256xf32>, i32 -> vector<2x256xf32>
    %c239_i32_40 = arith.constant 239 : i32
    %134 = tpu.dynamic_rotate %20 by %c239_i32_40 dim 1 : vector<2x256xf32>, i32 -> vector<2x256xf32>
    %135 = vector.broadcast %8 : f32 to vector<2x256xf32>
    %136 = arith.mulf %135, %133 : vector<2x256xf32>
    %137 = vector.broadcast %17 : f32 to vector<2x256xf32>
    %138 = arith.mulf %137, %134 : vector<2x256xf32>
    %139 = arith.addf %136, %138 : vector<2x256xf32>
    %c7_41 = arith.constant 7 : index
    %c0_42 = arith.constant 0 : index
    %140 = vector.load %arg2[%c7_41, %c0_42] : memref<8x256xf32, #tpu.memory_space<vmem>>, vector<1x256xf32>
    %cst_43 = arith.constant 5.000000e-01 : f32
    %141 = vector.broadcast %cst_43 : f32 to vector<1x256xf32>
    %142 = arith.cmpf ogt, %140, %141 : vector<1x256xf32>
    %cst_44 = arith.constant 0.000000e+00 : f32
    %143 = vector.shape_cast %142 : vector<1x256xi1> to vector<1x256xi1>
    %144 = vector.broadcast %143 : vector<1x256xi1> to vector<2x256xi1>
    %145 = vector.broadcast %cst_44 : f32 to vector<2x256xf32>
    %146 = arith.select %144, %139, %145 : vector<2x256xi1>, vector<2x256xf32>
    %147 = arith.addf %132, %146 : vector<2x256xf32>
    %148 = arith.negf %147 : vector<2x256xf32>
    %149 = math.exp %148 : vector<2x256xf32>
    %cst_45 = arith.constant 1.000000e+00 : f32
    %150 = vector.broadcast %cst_45 : f32 to vector<2x256xf32>
    %151 = arith.addf %150, %149 : vector<2x256xf32>
    %152 = arith.divf %150, %151 : vector<2x256xf32>
    %cst_46 = arith.constant 1.000000e+00 : f32
    %153 = vector.broadcast %cst_46 : f32 to vector<2x256xf32>
    %154 = arith.addf %153, %152 : vector<2x256xf32>
    %155 = vector.shape_cast %154 : vector<2x256xf32> to vector<2x1x256xf32>
    %156 = vector.shape_cast %155 : vector<2x1x256xf32> to vector<2x1x256xf32>
    %157 = vector.broadcast %156 : vector<2x1x256xf32> to vector<2x4x256xf32>
    %c0_47 = arith.constant 0 : index
    %c0_48 = arith.constant 0 : index
    %c0_49 = arith.constant 0 : index
    %158 = vector.load %arg3[%c0_47, %c0_48, %c0_49] : memref<2x4x256xf32, #tpu.memory_space<vmem>>, vector<2x4x256xf32>
    %159 = arith.mulf %158, %157 : vector<2x4x256xf32>
    %c0_50 = arith.constant 0 : index
    %c0_51 = arith.constant 0 : index
    %c0_52 = arith.constant 0 : index
    %160 = vector.load %arg4[%c0_50, %c0_51, %c0_52] : memref<2x4x256xf32, #tpu.memory_space<vmem>>, vector<2x4x256xf32>
    tpu.vector_store %arg4[%c0_50, %c0_51, %c0_52], %159 {strides = array<i32>} : memref<2x4x256xf32, #tpu.memory_space<vmem>>, vector<2x4x256xf32>,
    return
  }
  func.func @transform_0(%arg0: i32) -> i32 {
    %c0_i32 = arith.constant 0 : i32
    %c0_i32_0 = arith.constant 0 : i32
    return %c0_i32 : i32
  }
  func.func @transform_1(%arg0: i32) -> (i32, i32) {
    %c0_i32 = arith.constant 0 : i32
    %c0_i32_0 = arith.constant 0 : i32
    %c0_i32_1 = arith.constant 0 : i32
    return %c0_i32, %c0_i32_0 : i32, i32
  }
  func.func @transform_2(%arg0: i32) -> (i32, i32, i32) {
    %c0_i32 = arith.constant 0 : i32
    %c0_i32_0 = arith.constant 0 : i32
    %c0_i32_1 = arith.constant 0 : i32
    return %arg0, %c0_i32, %c0_i32_0 : i32, i32, i32
  }
  func.func @transform_3(%arg0: i32) -> (i32, i32, i32) {
    %c0_i32 = arith.constant 0 : i32
    %c0_i32_0 = arith.constant 0 : i32
    %c0_i32_1 = arith.constant 0 : i32
    return %arg0, %c0_i32, %c0_i32_0 : i32, i32, i32
  }
}

</mosaic_0001>

<bundles_post_ra>
// kernel: tpu_custom_call.1
= control target key start
LH: loop header
LB: loop body
LE: loop exit
PB: predicated region body
PF: predicated region fallthrough
CT: control target
= control target key end

     0   :  { %8 = vsyncpa [#allocation5], 0  ;;  %s1340_s0 = inlined_call_operand.hbm [shape: f32[18], index: 0, kind: input, shape index: {}]   ;;  %s1341_s1 = inlined_call_operand.hbm [shape: f32[8,256], index: 1, kind: input, shape index: {}]   ;;  %s1342_s2 = inlined_call_operand.hbm [shape: f32[2,4,256], index: 2, kind: input, shape index: {}]   ;;  %s1343_s3 = inlined_call_operand.hbm [shape: f32[2,4,256], index: 3, kind: output, shape index: {}]  }
   0x1   :  { %9 = vsyncpa [#allocation3], 0 }
   0x2   :  { %10 = vsyncpa [#allocation8], 0 }
   0x3   :  { %11 = vsyncpa [#allocation4], 0  ;;  %s692_s14 = scalar_lea.hbm %s1340_s0, 16 }
   0x4   :  { %p693_p0 = scmp.ne.s32.totalorder %s1340_s0, %s692_s14  ;;  %p696_p1 = scmp.lt.u32.totalorder %s692_s14, %s1340_s0 }
   0x6   :  { %p698_p2 = pnand %p696_p1, %p693_p0 }
   0x8   :  { %701 = shalt.err (!%p698_p2)
}
   0x9   :  { %s776_s19 = smov [#allocation2]   ;;  %s777_s22 = smov [#allocation6]  }
   0xa   :  { %19 = dma.hbm_to_smem %s1340_s0, 16, %s776_s19, [#allocation5]  }
   0xb   :  { %s26_s23 = sshll.u32 %s777_s22, 4  ;;  %s778_s24 = smov [#allocation7]   ;;  %s27_s23 = int_to_ptr.vmem [resolvable:$true] %s26_s23 }
   0xc   :  { %s35_s25 = sshll.u32 %s778_s24, 4  ;;  %s702_s28 = scalar_lea.hbm %s1341_s1, 256  ;;  %s36_s25 = int_to_ptr.vmem [resolvable:$true] %s35_s25 }
   0xd   :  { %p703_p3 = scmp.ne.s32.totalorder %s1341_s1, %s702_s28  ;;  %p706_p4 = scmp.lt.u32.totalorder %s702_s28, %s1341_s1 }
   0xf   :  { %p708_p5 = pnand %p706_p4, %p703_p3 }
  0x11   :  { %711 = shalt.err (!%p708_p5)
}
  0x12   :  { %s712_s0 = scalar_lea.vmem %s27_s23, 256  ;;  %p717_p7 = scmp.lt.s32.totalorder %s27_s23, %s27_s23 }
  0x13   :  { %p713_p6 = scmp.ne.s32.totalorder %s27_s23, %s712_s0  ;;  %p718_p8 = scmp.lt.s32.totalorder %s712_s0, %s712_s0 }
  0x15   :  { %p719_p9 = por %p718_p8, %p717_p7 }
  0x17   :  { %p720_p10 = pnand %p719_p9, %p713_p6 }
  0x19   :  { %723 = shalt.err (!%p720_p10)
}
  0x1a   :  { %29 = dma.hbm_to_vmem [thread:$0]  %s1341_s1, 256, %s27_s23, [#allocation3]  }
  0x1b   :  { %s724_s10 = scalar_lea.hbm %s1342_s2, 256 }
  0x1c   :  { %p725_p11 = scmp.ne.s32.totalorder %s1342_s2, %s724_s10  ;;  %p728_p12 = scmp.lt.u32.totalorder %s724_s10, %s1342_s2 }
  0x1e   :  { %p730_p13 = pnand %p728_p12, %p725_p11 }
  0x20   :  { %733 = shalt.err (!%p730_p13)
}
  0x21   :  { %s734_s15 = scalar_lea.vmem %s36_s25, 256  ;;  %p739_p1 = scmp.lt.s32.totalorder %s36_s25, %s36_s25 }
  0x22   :  { %p735_p0 = scmp.ne.s32.totalorder %s36_s25, %s734_s15  ;;  %p740_p2 = scmp.lt.s32.totalorder %s734_s15, %s734_s15 }
  0x24   :  { %p741_p3 = por %p740_p2, %p739_p1 }
  0x26   :  { %p742_p4 = pnand %p741_p3, %p735_p0 }
  0x28   :  { %745 = shalt.err (!%p742_p4)
}
  0x29   :  { %s779_s1 = smov 128   ;;  %s780_s16 = smov 8  }
  0x2a   :  { %41 = dma.hbm_to_vmem [thread:$0]  %s1342_s2, 256, %s36_s25, [#allocation8], %s779_s1, %s779_s1, %s780_s16  }
  0x2b   :  { %768 = dma.done.wait [#allocation5], 16  }
  0x2c   :  { %769 = vsyncadd [#allocation5], 4294967280 }
  0x2d   :  { %770 = dma.done.wait [#allocation3], 256  }
  0x2e   :  { %771 = vsyncadd [#allocation3], 4294967040 }
  0x2f   :  { %772 = dma.done.wait [#allocation8], 256  }
  0x30   :  { %773 = vsyncadd [#allocation8], 4294967040 }
  0x31   :  { %51 = sfence }
  0x32   :  { %v850_v0 = vld [vmem:[#allocation7] sm:$0xff]  ;;  %v852_v1 = vld [vmem:[#allocation7 + $0x8] sm:$0xff]  ;;  %vm78_vm0 = vcmask 1043456   ;;  %vm157_vm1 = vcmask 1041409   ;;  %s781_s2 = smov 16   ;;  %s782_s19 = smov 17  }
  0x33   :  { %v107_v2 = vsel %vm78_vm0, %v850_v0, -inf  ;;  %v121_v3 = vsel %vm78_vm0, %v852_v1, -inf  ;;  %v79_v4 = vsel %vm78_vm0, %v850_v0, 0.0  ;;  %v93_v5 = vsel %vm78_vm0, %v852_v1, 0.0  ;;  %s641_s20 = sld [smem:[#allocation2 + $0x4]]  ;;  %s650_s21 = sld [smem:[#allocation2 + $0xd]] }
  0x34   :  { %v108_v6 = vrot.slane %v107_v2, 4  ;;  %v122_v7 = vrot.slane %v121_v3, 4  ;;  %v80_v8 = vrot.slane %v79_v4, 4  ;;  %v94_v9 = vrot.slane %v93_v5, 4  ;;  %s783_s22 = smov 15   ;;  %s784_s23 = smov 1  }
  0x35   :  { %v74_v10 = vcombine.high %v850_v0, %v850_v0  ;;  %v75_v11 = vcombine.high %v852_v1, %v852_v1  ;;  %s785_s24 = smov 127   ;;  %s786_s25 = smov 113  }
  0x36   :  { %v109_v12 = vmax.f32 %v107_v2, %v108_v6  ;;  %v123_v13 = vmax.f32 %v121_v3, %v122_v7  ;;  %v81_v14 = vadd.f32 %v80_v8, %v79_v4  ;;  %v95_v15 = vadd.f32 %v94_v9, %v93_v5  ;;  %s787_s26 = smov 112   ;;  %s788_s27 = smov 111  }
  0x37   :  { %v114_v16 = vsel %vm78_vm0, %v74_v10, -inf  ;;  %v128_v17 = vsel %vm78_vm0, %v75_v11, -inf  ;;  %v86_v18 = vsel %vm78_vm0, %v74_v10, 0.0  ;;  %v100_v19 = vsel %vm78_vm0, %v75_v11, 0.0  ;;  %s914_s28 = sld [smem:[#allocation2 + $0x9]]  ;;  %s916_s29 = sld [smem:[#allocation2 + $0xa]] }
  0x38   :  { %v110_v20 = vrot.slane %v109_v12, 2  ;;  %v124_v21 = vrot.slane %v123_v13, 2  ;;  %v82_v22 = vrot.slane %v81_v14, 2  ;;  %v96_v23 = vrot.slane %v95_v15, 2  ;;  %s920_s30 = sld [smem:[#allocation2 + $0x1]]  ;;  %s924_s4 = sld [smem:[#allocation2 + $0x2]] }
  0x39   :  { %v115_v24 = vrot.slane %v114_v16, 4  ;;  %v129_v25 = vrot.slane %v128_v17, 4  ;;  %v87_v26 = vrot.slane %v86_v18, 4  ;;  %v101_v27 = vrot.slane %v100_v19, 4  ;;  %s926_s5 = sld [smem:[#allocation2]]  ;;  %s930_s0 = sld [smem:[#allocation2 + $0xb]] }
  0x3a   :  { %v111_v28 = vmax.f32 %v109_v12, %v110_v20  ;;  %v125_v29 = vmax.f32 %v123_v13, %v124_v21  ;;  %v83_v30 = vadd.f32 %v82_v22, %v81_v14  ;;  %v97_v31 = vadd.f32 %v96_v23, %v95_v15  ;;  %s932_s6 = sld [smem:[#allocation2 + $0x3]]  ;;  %s934_s7 = sld [smem:[#allocation2 + $0xc]] }
  0x3b   :  { %v116_v32 = vmax.f32 %v114_v16, %v115_v24  ;;  %v130_v33 = vmax.f32 %v128_v17, %v129_v25  ;;  %v88_v34 = vadd.f32 %v87_v26, %v86_v18  ;;  %v102_v35 = vadd.f32 %v101_v27, %v100_v19  ;;  %s936_s8 = sld [smem:[#allocation2 + $0x5]]  ;;  %s945_s9 = sld [smem:[#allocation2 + $0xe]] }
  0x3c   :  { %v112_v36 = vrot.slane %v111_v28, 1  ;;  %v126_v37 = vrot.slane %v125_v29, 1  ;;  %v84_v38 = vrot.slane %v83_v30, 1  ;;  %v98_v39 = vrot.slane %v97_v31, 1  ;;  %s958_s10 = sld [smem:[#allocation2 + $0x6]]  ;;  %s972_s11 = sld [smem:[#allocation2 + $0xf]] }
  0x3d   :  { %v117_v40 = vrot.slane %v116_v32, 2  ;;  %v131_v41 = vrot.slane %v130_v33, 2  ;;  %v89_v42 = vrot.slane %v88_v34, 2  ;;  %v103_v43 = vrot.slane %v102_v35, 2  ;;  %s985_s12 = sld [smem:[#allocation2 + $0x7]]  ;;  %s1009_s13 = sld [smem:[#allocation2 + $0x10]] }
  0x3e   :  { %v113_v44 = vmax.f32 %v111_v28, %v112_v36  ;;  %v127_v45 = vmax.f32 %v125_v29, %v126_v37  ;;  %v85_v46 = vadd.f32 %v84_v38, %v83_v30  ;;  %v99_v47 = vadd.f32 %v98_v39, %v97_v31  ;;  %v193_v29 = vld [vmem:[#allocation6] ss:$8 sm:$0x3]  ;;  %v242_v31 = vld [vmem:[#allocation6 + $0x1] ss:$8 sm:$0x3] }
  0x3f   :  { %v118_v48 = vmax.f32 %v116_v32, %v117_v40  ;;  %v132_v49 = vmax.f32 %v130_v33, %v131_v41  ;;  %v90_v50 = vadd.f32 %v89_v42, %v88_v34  ;;  %v104_v51 = vadd.f32 %v103_v43, %v102_v35  ;;  %v291_v34 = vld [vmem:[#allocation6 + $0x2] ss:$8 sm:$0x3]  ;;  %v340_v36 = vld [vmem:[#allocation6 + $0x3] ss:$8 sm:$0x3] }
  0x40   :  { %v871_v52 = vsel %vm157_vm1, %v127_v45, %v113_v44  ;;  %v135_v53 = vmul.f32 0.25, %v85_v46  ;;  %v137_v54 = vmul.f32 0.25, %v99_v47  ;;  %v139_v5 = vstv %s641_s20  ;;  %v389_v37 = vld [vmem:[#allocation6 + $0x4] ss:$8 sm:$0x3]  ;;  %s1042_s14 = sld [smem:[#allocation2 + $0x8]] }
  0x41   :  { %227 = vrot.lane.b32.xlu0 %v871_v52, %s781_s2  ;;  %179 = vrot.lane.b32.xlu1 %v871_v52, %s782_s19  ;;  %v119_v55 = vrot.slane %v118_v48, 1  ;;  %v133_v56 = vrot.slane %v132_v49, 1  ;;  %v91_v57 = vrot.slane %v90_v50, 1  ;;  %v105_v58 = vrot.slane %v104_v51, 1  ;;  %s1044_s15 = sld [smem:[#allocation2 + $0x11]]  ;;  %s790_s17 = smov [#allocation9]  }
  0x42   :  { %v158_v59 = vsel %vm157_vm1, %v137_v54, %v135_v53  ;;  %v140_v6 = vmul.f32 %v139_v5, %v135_v53  ;;  %v142_v8 = vmul.f32 %v139_v5, %v137_v54  ;;  %v144_v10 = vstv %s650_s21  ;;  %s624_s18 = sshll.u32 %s790_s17, 4  ;;  %s625_s18 = int_to_ptr.vmem [resolvable:$true] %s624_s18 }
  0x43   :  { %v120_v60 = vmax.f32 %v118_v48, %v119_v55  ;;  %v134_v61 = vmax.f32 %v132_v49, %v133_v56  ;;  %v92_v62 = vadd.f32 %v91_v57, %v90_v50  ;;  %v106_v63 = vadd.f32 %v105_v58, %v104_v51  ;;  %v438_v57 = vld [vmem:[#allocation6 + $0x5] ss:$8 sm:$0x3]  ;;  %p751_p6 = scmp.lt.s32.totalorder %s625_s18, %s625_s18 }
  0x44   :  { %v145_v12 = vmul.f32 %v144_v10, %v113_v44  ;;  %v147_v14 = vmul.f32 %v144_v10, %v127_v45  ;;  %v166_v26 = vlaneseq  ;;  %vm194_vm2 = vcmp.gt.f32.partialorder %v193_v29, 0.5 }
  0x45   :  { %162 = vrot.lane.b32.xlu0 %v158_v59, %s782_s19  ;;  %v176_v2 = vsel %vm157_vm1, %v134_v61, %v120_v60  ;;  %v136_v3 = vmul.f32 0.25, %v92_v62  ;;  %v138_v4 = vmul.f32 0.25, %v106_v63  ;;  %v146_v13 = vmul.f32 %v144_v10, %v120_v60  ;;  %v487_v63 = vld [vmem:[#allocation6 + $0x6] ss:$8 sm:$0x3] }
  0x46   :  { %181 = vrot.lane.b32.xlu1 %v176_v2, %s782_s19  ;;  %v148_v15 = vmul.f32 %v144_v10, %v134_v61  ;;  %v884_v16 = vadd.f32 %v145_v12, %v140_v6  ;;  %v889_v18 = vadd.f32 %v147_v14, %v142_v8  ;;  %v922_v30 = vand.u32 127, %v166_v26 }
  0x47   :  { %v141_v7 = vmul.f32 %v139_v5, %v136_v3  ;;  %v143_v9 = vmul.f32 %v139_v5, %v138_v4  ;;  %v159_v11 = vsel %vm157_vm1, %v138_v4, %v136_v3  ;;  %v197_v32 = vshrl.u32 %v166_v26, 7 }
  0x48   :  { %vm243_vm3 = vcmp.gt.f32.partialorder %v242_v31, 0.5  ;;  %vm292_vm4 = vcmp.gt.f32.partialorder %v291_v34, 0.5  ;;  %v789_v40 = vmov 0   ;;  %vm341_vm5 = vcmp.gt.f32.partialorder %v340_v36, 0.5 }
  0x49   :  { %220 = vrot.lane.b32.xlu0 %v158_v59, %s781_s2  ;;  %v886_v17 = vadd.f32 %v146_v13, %v141_v7  ;;  %v891_v19 = vadd.f32 %v148_v15, %v143_v9  ;;  %v938_v38 = vsub.s32 0, %v197_v32  ;;  %v940_v39 = vsub.s32 1, %v197_v32  ;;  %v536_v15 = vld [vmem:[#allocation6 + $0x7] ss:$8 sm:$0x3] }
  0x4a   :  { %229 = vrot.lane.b32.xlu1 %v176_v2, %s781_s2  ;;  %v195_v41 = vsel %vm194_vm2, 1, %v789_v40  ;;  %vm168_vm6 = vcmp.lt.s32.totalorder %v922_v30, 17  ;;  %v188_v43 = vstv %s914_s28  ;;  %v244_v44 = vsel %vm243_vm3, 1, %v789_v40 }
  0x4b   :  { %vm224_vm7 = vcmp.lt.s32.totalorder %v922_v30, 16  ;;  %v236_v46 = vstv %s916_s29  ;;  %v956_v47 = vsel %vm292_vm4, 1, %v789_v40  ;;  %vm390_vm8 = vcmp.gt.f32.partialorder %v389_v37, 0.5 }
  0x4c   :  { %v233_v48 = vstv %s920_s30  ;;  %v199_v49 = vrot.slane %v195_v41, %v938_v38  ;;  %v203_v50 = vrot.slane %v195_v41, %v940_v39  ;;  %v964_v51 = vsel %vm341_vm5, 1, %v789_v40 }
  0x4d   :  { %269 = vrot.lane.b32.xlu0 %v158_v59, %s783_s22  ;;  %v252_v53 = vrot.slane %v244_v44, %v940_v39  ;;  %v282_v54 = vstv %s924_s4  ;;  %v185_v55 = vstv %s926_s5  ;;  %v297_v58 = vrot.slane %v956_v47, %v938_v38 }
  0x4e   :  { %222 = vrot.lane.b32.xlu1 %v159_v11, %s781_s2  ;;  %v285_v60 = vstv %s930_s0  ;;  %v983_v62 = vsel %vm390_vm8, 1, %v789_v40  ;;  %vm273_vm9 = vcmp.lt.s32.totalorder %v922_v30, 15  ;;  %v346_v3 = vrot.slane %v964_v51, %v938_v38  ;;  %s746_s2 = scalar_lea.vmem %s625_s18, 256 }
  0x4f   :  { %v350_v4 = vrot.slane %v964_v51, %v940_v39  ;;  %v334_v5 = vstv %s934_s7  ;;  %vm994_vm10 = vcmp.eq.s32.totalorder %v199_v49, 1  ;;  %vm998_vm11 = vcmp.eq.s32.totalorder %v203_v50, 1  ;;  %p747_p5 = scmp.ne.s32.totalorder %s625_s18, %s746_s2  ;;  %p752_p7 = scmp.lt.s32.totalorder %s746_s2, %s746_s2 }
  0x50   :  { %v380_v10 = vstv %s936_s8  ;;  %vm439_vm12 = vcmp.gt.f32.partialorder %v438_v57, 0.5  ;;  %v395_v12 = vrot.slane %v983_v62, %v938_v38  ;;  %v399_v13 = vrot.slane %v983_v62, %v940_v39 }
  0x51   :  { %164 = vrot.lane.b32.xlu0 %v159_v11, %s782_s19  ;;  %v383_v14 = vstv %s945_s9  ;;  %vm488_vm13 = vcmp.gt.f32.partialorder %v487_v63, 0.5  ;;  %vm1030_vm15 = vcmp.eq.s32.totalorder %v252_v53, 1  ;;  %vm322_vm0 = vcmp.lt.s32.totalorder %v922_v30, 1  ;;  %p753_p8 = por %p752_p7, %p751_p6 }
  0x52   :  { %271 = vrot.lane.b32.xlu1 %v159_v11, %s783_s22  ;;  %v1050_v37 = vsel %vm439_vm12, 1, %v789_v40  ;;  %v1062_v41 = vsel %vm488_vm13, 1, %v789_v40  ;;  %vm537_vm1 = vcmp.gt.f32.partialorder %v536_v15, 0.5  ;;  %vm371_vm2 = vcmp.lt.s32.totalorder %v922_v30, 127 }
  0x53   :  { %v432_v57 = vstv %s972_s11  ;;  %vm1109_vm3 = vcmp.eq.s32.totalorder %v297_v58, 1  ;;  %vm420_vm5 = vcmp.lt.s32.totalorder %v922_v30, 113  ;;  %vm469_vm8 = vcmp.lt.s32.totalorder %v922_v30, 112  ;;  %p754_p9 = pnand %p753_p8, %p747_p5 }
  0x54   :  { %vm518_vm13 = vcmp.lt.s32.totalorder %v922_v30, 111 }
  0x55   :  { %276 = vrot.lane.b32.xlu0 %v871_v52, %s783_s22 }
  0x56   :  { %278 = vrot.lane.b32.xlu1 %v176_v2, %s783_s22 }
  0x59   :  { %318 = vrot.lane.b32.xlu0 %v158_v59, %s784_s23 }
  0x5a   :  { %320 = vrot.lane.b32.xlu1 %v159_v11, %s784_s23 }
  0x5d   :  { %325 = vrot.lane.b32.xlu0 %v871_v52, %s784_s23 }
  0x5e   :  { %327 = vrot.lane.b32.xlu1 %v176_v2, %s784_s23 }
  0x61   :  { %367 = vrot.lane.b32.xlu0 %v158_v59, %s785_s24 }
  0x62   :  { %369 = vrot.lane.b32.xlu1 %v159_v11, %s785_s24 }
  0x65   :  { %374 = vrot.lane.b32.xlu0 %v871_v52, %s785_s24 }
  0x66   :  { %376 = vrot.lane.b32.xlu1 %v176_v2, %s785_s24 }
  0x69   :  { %416 = vrot.lane.b32.xlu0 %v158_v59, %s786_s25 }
  0x6a   :  { %418 = vrot.lane.b32.xlu1 %v159_v11, %s786_s25 }
  0x6d   :  { %423 = vrot.lane.b32.xlu0 %v871_v52, %s786_s25 }
  0x6e   :  { %425 = vrot.lane.b32.xlu1 %v176_v2, %s786_s25 }
  0x71   :  { %465 = vrot.lane.b32.xlu0 %v158_v59, %s787_s26 }
  0x72   :  { %467 = vrot.lane.b32.xlu1 %v159_v11, %s787_s26 }
  0x75   :  { %472 = vrot.lane.b32.xlu0 %v871_v52, %s787_s26 }
  0x76   :  { %474 = vrot.lane.b32.xlu1 %v176_v2, %s787_s26 }
  0x79   :  { %514 = vrot.lane.b32.xlu0 %v158_v59, %s788_s27  ;;  %v301_v59 = vrot.slane %v956_v47, %v940_v39 }
  0x7a   :  { %516 = vrot.lane.b32.xlu1 %v159_v11, %s788_s27 }
  0x7b   :  { %vm1116_vm4 = vcmp.eq.s32.totalorder %v301_v59, 1 }
  0x7d   :  { %521 = vrot.lane.b32.xlu0 %v871_v52, %s788_s27  ;;  %v248_v52 = vrot.slane %v244_v44, %v938_v38 }
  0x7e   :  { %523 = vrot.lane.b32.xlu1 %v176_v2, %s788_s27  ;;  %v331_v2 = vstv %s932_s6 }
  0x7f   :  { %vm1026_vm14 = vcmp.eq.s32.totalorder %v248_v52, 1 }
  0xb3   :  { %v900_v20 = vpop.permute.xlu0 %227  ;;  %v902_v21 = vpop.permute.xlu1 %179 }
  0xb7   :  { %v904_v22 = vpop.permute.xlu0 %162 }
  0xb8   :  { %v906_v23 = vpop.permute.xlu1 %181 }
  0xb9   :  { %v184_v26 = vsel %vm168_vm6, %v906_v23, %v902_v21 }
  0xba   :  { %v189_v44 = vmul.f32 %v188_v43, %v184_v26  ;;  %v497_v26 = vrot.slane %v1062_v41, %v940_v39 }
  0xbb   :  { %v908_v24 = vpop.permute.xlu0 %220 }
  0xbc   :  { %v910_v25 = vpop.permute.xlu1 %229 }
  0xbf   :  { %v912_v27 = vpop.permute.xlu0 %269 }
  0xc0   :  { %v918_v28 = vpop.permute.xlu1 %222 }
  0xc1   :  { %v225_v32 = vsel %vm224_vm7, %v908_v24, %v918_v28 }
  0xc2   :  { %v235_v52 = vmul.f32 %v233_v48, %v225_v32  ;;  %v481_v32 = vstv %s1009_s13 }
  0xc3   :  { %v165_v33 = vpop.permute.xlu0 %164 }
  0xc4   :  { %v928_v35 = vpop.permute.xlu1 %271  ;;  %v169_v8 = vsel %vm168_vm6, %v904_v22, %v165_v33  ;;  %v170_v9 = vsel %vm168_vm6, %v165_v33, %v904_v22  ;;  %v183_v22 = vsel %vm168_vm6, %v902_v21, %v906_v23  ;;  %v226_v21 = vsel %vm224_vm7, %v918_v28, %v908_v24 }
  0xc5   :  { %v186_v33 = vmul.f32 %v185_v55, %v170_v9  ;;  %v187_v34 = vmul.f32 %v185_v55, %v169_v8  ;;  %v231_v24 = vsel %vm224_vm7, %v900_v20, %v910_v25  ;;  %v232_v28 = vsel %vm224_vm7, %v910_v25, %v900_v20 }
  0xc6   :  { %v190_v49 = vmul.f32 %v188_v43, %v183_v22  ;;  %v234_v50 = vmul.f32 %v233_v48, %v226_v21  ;;  %v444_v20 = vrot.slane %v1050_v37, %v938_v38  ;;  %v448_v25 = vrot.slane %v1050_v37, %v940_v39 }
  0xc7   :  { %v943_v42 = vpop.permute.xlu0 %276  ;;  %v237_v8 = vmul.f32 %v236_v46, %v232_v28  ;;  %v238_v43 = vmul.f32 %v236_v46, %v231_v24  ;;  %v191_v9 = vadd.f32 %v189_v44, %v186_v33  ;;  %v493_v22 = vrot.slane %v1062_v41, %v938_v38 }
  0xc8   :  { %v950_v45 = vpop.permute.xlu1 %278  ;;  %v192_v48 = vadd.f32 %v190_v49, %v187_v34  ;;  %v1088_v21 = vsel %vm537_vm1, 1, %v789_v40  ;;  %v274_v40 = vsel %vm273_vm9, %v912_v27, %v928_v35  ;;  %v275_v15 = vsel %vm273_vm9, %v928_v35, %v912_v27 }
  0xc9   :  { %v239_v63 = vadd.f32 %v237_v8, %v234_v50  ;;  %v240_v36 = vadd.f32 %v238_v43, %v235_v52  ;;  %v280_v46 = vsel %vm273_vm9, %v943_v42, %v950_v45  ;;  %v281_v33 = vsel %vm273_vm9, %v950_v45, %v943_v42 }
  0xca   :  { %v527_v28 = vstv %s1042_s14  ;;  %v530_v44 = vstv %s1044_s15  ;;  %v206_v27 = vsel %vm994_vm10, %v191_v9, 0.0  ;;  %v207_v35 = vsel %vm998_vm11, %v192_v48, 0.0 }
  0xcb   :  { %v970_v56 = vpop.permute.xlu0 %318  ;;  %v542_v47 = vrot.slane %v1088_v21, %v938_v38  ;;  %v546_v58 = vrot.slane %v1088_v21, %v940_v39  ;;  %v286_v59 = vmul.f32 %v285_v60, %v281_v33  ;;  %v287_v49 = vmul.f32 %v285_v60, %v280_v46 }
  0xcc   :  { %v979_v61 = vpop.permute.xlu1 %320  ;;  %vm1138_vm6 = vcmp.eq.s32.totalorder %v346_v3, 1  ;;  %vm1145_vm7 = vcmp.eq.s32.totalorder %v350_v4, 1  ;;  %v255_v3 = vsel %vm1026_vm14, %v239_v63, 0.0  ;;  %v256_v52 = vsel %vm1030_vm15, %v240_v36, 0.0 }
  0xcd   :  { %v283_v51 = vmul.f32 %v282_v54, %v275_v15  ;;  %v284_v4 = vmul.f32 %v282_v54, %v274_v40  ;;  %v210_v43 = vrot.slane %v206_v27, 1  ;;  %v211_v9 = vrot.slane %v207_v35, 1 }
  0xce   :  { %v324_v29 = vsel %vm322_vm0, %v979_v61, %v970_v56  ;;  %vm1179_vm9 = vcmp.eq.s32.totalorder %v395_v12, 1  ;;  %vm1186_vm10 = vcmp.eq.s32.totalorder %v399_v13, 1  ;;  %v216_v63 = vadd.f32 %v206_v27, %v884_v16 }
  0xcf   :  { %v1011_v11 = vpop.permute.xlu0 %325  ;;  %v217_v12 = vadd.f32 %v207_v35, %v886_v17  ;;  %v288_v48 = vadd.f32 %v286_v59, %v283_v51  ;;  %v289_v46 = vadd.f32 %v287_v49, %v284_v4  ;;  %v332_v62 = vmul.f32 %v331_v2, %v324_v29 }
  0xd0   :  { %v328_v23 = vpop.permute.xlu1 %327  ;;  %v259_v16 = vrot.slane %v255_v3, 1  ;;  %v260_v15 = vrot.slane %v256_v52, 1  ;;  %v218_v35 = vadd.f32 %v210_v43, %v889_v18  ;;  %vm1219_vm11 = vcmp.eq.s32.totalorder %v444_v20, 1 }
  0xd1   :  { %v329_v60 = vsel %vm322_vm0, %v1011_v11, %v328_v23  ;;  %v330_v50 = vsel %vm322_vm0, %v328_v23, %v1011_v11  ;;  %v323_v11 = vsel %vm322_vm0, %v970_v56, %v979_v61  ;;  %vm1226_vm12 = vcmp.eq.s32.totalorder %v448_v25, 1 }
  0xd2   :  { %v335_v54 = vmul.f32 %v334_v5, %v330_v50  ;;  %v336_v23 = vmul.f32 %v334_v5, %v329_v60  ;;  %v333_v13 = vmul.f32 %v331_v2, %v323_v11  ;;  %v219_v2 = vadd.f32 %v211_v9, %v891_v19 }
  0xd3   :  { %v1068_v53 = vpop.permute.xlu0 %367  ;;  %v304_v20 = vsel %vm1109_vm3, %v288_v48, 0.0  ;;  %v305_v37 = vsel %vm1116_vm4, %v289_v46, 0.0  ;;  %vm1246_vm14 = vcmp.eq.s32.totalorder %v493_v22, 1  ;;  %vm1253_vm15 = vcmp.eq.s32.totalorder %v497_v26, 1 }
  0xd4   :  { %v370_v55 = vpop.permute.xlu1 %369  ;;  %v337_v59 = vadd.f32 %v335_v54, %v332_v62  ;;  %v338_v49 = vadd.f32 %v336_v23, %v333_v13  ;;  %v267_v29 = vadd.f32 %v259_v16, %v218_v35  ;;  %v308_v54 = vrot.slane %v304_v20, 1 }
  0xd5   :  { %v372_v33 = vsel %vm371_vm2, %v1068_v53, %v370_v55  ;;  %v309_v23 = vrot.slane %v305_v37, 1  ;;  %v1372_v41 = vstv %s958_s10  ;;  %v1374_v16 = vstv %s985_s12 }
  0xd6   :  { %v381_v60 = vmul.f32 %v380_v10, %v372_v33  ;;  %v353_v9 = vsel %vm1138_vm6, %v337_v59, 0.0  ;;  %vm547_vm0 = vcmp.eq.s32.totalorder %v542_v47, 1  ;;  %vm548_vm1 = vcmp.eq.s32.totalorder %v546_v58, 1 }
  0xd7   :  { %v375_v34 = vpop.permute.xlu0 %374 }
  0xd8   :  { %v377_v45 = vpop.permute.xlu1 %376 }
  0xd9   :  { %v378_v61 = vsel %vm371_vm2, %v375_v34, %v377_v45  ;;  %v379_v5 = vsel %vm371_vm2, %v377_v45, %v375_v34  ;;  %v373_v34 = vsel %vm371_vm2, %v370_v55, %v1068_v53  ;;  %v266_v55 = vadd.f32 %v256_v52, %v217_v12 }
  0xda   :  { %v384_v17 = vmul.f32 %v383_v14, %v378_v61  ;;  %v385_v45 = vmul.f32 %v383_v14, %v379_v5  ;;  %v382_v50 = vmul.f32 %v380_v10, %v373_v34  ;;  %v265_v14 = vadd.f32 %v255_v3, %v216_v63 }
  0xdb   :  { %v417_v8 = vpop.permute.xlu0 %416  ;;  %v1373_v61 = vmov %v1372_v41  ;;  %v315_v56 = vadd.f32 %v305_v37, %v266_v55 }
  0xdc   :  { %v419_v31 = vpop.permute.xlu1 %418  ;;  %v386_v51 = vadd.f32 %v384_v17, %v381_v60  ;;  %v387_v4 = vadd.f32 %v385_v45, %v382_v50  ;;  %v1375_v17 = vmov %v1374_v16  ;;  %v314_v35 = vadd.f32 %v304_v20, %v265_v14 }
  0xdd   :  { %v421_v43 = vsel %vm420_vm5, %v417_v8, %v419_v31  ;;  %v422_v3 = vsel %vm420_vm5, %v419_v31, %v417_v8  ;;  %v354_v8 = vsel %vm1145_vm7, %v338_v49, 0.0  ;;  %v268_v31 = vadd.f32 %v260_v15, %v219_v2 }
  0xde   :  { %v430_v26 = vmul.f32 %v1372_v41, %v421_v43  ;;  %v431_v5 = vmul.f32 %v1373_v61, %v422_v3  ;;  %v358_v12 = vrot.slane %v354_v8, 1  ;;  %v402_v48 = vsel %vm1179_vm9, %v386_v51, 0.0 }
  0xdf   :  { %v424_v40 = vpop.permute.xlu0 %423  ;;  %v403_v46 = vsel %vm1186_vm10, %v387_v4, 0.0  ;;  %v316_v2 = vadd.f32 %v308_v54, %v267_v29  ;;  %v317_v59 = vadd.f32 %v309_v23, %v268_v31  ;;  %v406_v60 = vrot.slane %v402_v48, 1 }
  0xe0   :  { %v426_v27 = vpop.permute.xlu1 %425  ;;  %v407_v50 = vrot.slane %v403_v46, 1  ;;  %v363_v51 = vadd.f32 %v353_v9, %v314_v35  ;;  %v364_v4 = vadd.f32 %v354_v8, %v315_v56 }
  0xe1   :  { %v427_v19 = vsel %vm420_vm5, %v424_v40, %v426_v27  ;;  %v428_v10 = vsel %vm420_vm5, %v426_v27, %v424_v40  ;;  %v366_v14 = vadd.f32 %v358_v12, %v317_v59 }
  0xe2   :  { %v433_v11 = vmul.f32 %v432_v57, %v427_v19  ;;  %v434_v22 = vmul.f32 %v432_v57, %v428_v10  ;;  %v357_v57 = vrot.slane %v353_v9, 1  ;;  %v412_v37 = vadd.f32 %v402_v48, %v363_v51 }
  0xe3   :  { %v466_v25 = vpop.permute.xlu0 %465 }
  0xe4   :  { %v468_v52 = vpop.permute.xlu1 %467  ;;  %v435_v13 = vadd.f32 %v433_v11, %v430_v26  ;;  %v436_v33 = vadd.f32 %v434_v22, %v431_v5  ;;  %v415_v11 = vadd.f32 %v407_v50, %v366_v14 }
  0xe5   :  { %v470_v6 = vsel %vm469_vm8, %v466_v25, %v468_v52  ;;  %v471_v7 = vsel %vm469_vm8, %v468_v52, %v466_v25  ;;  %v413_v52 = vadd.f32 %v403_v46, %v364_v4 }
  0xe6   :  { %v479_v15 = vmul.f32 %v1374_v16, %v470_v6  ;;  %v480_v45 = vmul.f32 %v1375_v17, %v471_v7  ;;  %v451_v43 = vsel %vm1219_vm11, %v435_v13, 0.0  ;;  %v452_v3 = vsel %vm1226_vm12, %v436_v33, 0.0 }
  0xe7   :  { %v473_v63 = vpop.permute.xlu0 %472  ;;  %v455_v22 = vrot.slane %v451_v43, 1  ;;  %v456_v29 = vrot.slane %v452_v3, 1  ;;  %v461_v6 = vadd.f32 %v451_v43, %v412_v37  ;;  %v462_v7 = vadd.f32 %v452_v3, %v413_v52 }
  0xe8   :  { %v475_v62 = vpop.permute.xlu1 %474 }
  0xe9   :  { %v476_v34 = vsel %vm469_vm8, %v473_v63, %v475_v62  ;;  %v477_v40 = vsel %vm469_vm8, %v475_v62, %v473_v63  ;;  %v464_v63 = vadd.f32 %v456_v29, %v415_v11 }
  0xea   :  { %v482_v27 = vmul.f32 %v481_v32, %v476_v34  ;;  %v483_v36 = vmul.f32 %v481_v32, %v477_v40  ;;  %v365_v32 = vadd.f32 %v357_v57, %v316_v2 }
  0xeb   :  { %v515_v49 = vpop.permute.xlu0 %514 }
  0xec   :  { %v484_v19 = vadd.f32 %v482_v27, %v479_v15  ;;  %v485_v10 = vadd.f32 %v483_v36, %v480_v45  ;;  %v517_v25 = vpop.permute.xlu1 %516  ;;  %v414_v8 = vadd.f32 %v406_v60, %v365_v32 }
  0xed   :  { %v519_v55 = vsel %vm518_vm13, %v515_v49, %v517_v25  ;;  %v520_v20 = vsel %vm518_vm13, %v517_v25, %v515_v49 }
  0xee   :  { %v500_v53 = vsel %vm1246_vm14, %v484_v19, 0.0  ;;  %v501_v18 = vsel %vm1253_vm15, %v485_v10, 0.0  ;;  %v528_v54 = vmul.f32 %v527_v28, %v519_v55  ;;  %v529_v23 = vmul.f32 %v527_v28, %v520_v20 }
  0xef   :  { %v522_v9 = vpop.permute.xlu0 %521  ;;  %v504_v26 = vrot.slane %v500_v53, 1  ;;  %v505_v61 = vrot.slane %v501_v18, 1  ;;  %v463_v28 = vadd.f32 %v455_v22, %v414_v8  ;;  %v510_v12 = vadd.f32 %v500_v53, %v461_v6 }
  0xf0   :  { %v524_v31 = vpop.permute.xlu1 %523  ;;  %v511_v48 = vadd.f32 %v501_v18, %v462_v7 }
  0xf1   :  { %v525_v41 = vsel %vm518_vm13, %v522_v9, %v524_v31  ;;  %v526_v24 = vsel %vm518_vm13, %v524_v31, %v522_v9  ;;  %v512_v46 = vadd.f32 %v504_v26, %v463_v28  ;;  %v513_v62 = vadd.f32 %v505_v61, %v464_v63 }
  0xf2   :  { %v531_v42 = vmul.f32 %v530_v44, %v525_v41  ;;  %v532_v5 = vmul.f32 %v530_v44, %v526_v24 }
  0xf4   :  { %v533_v30 = vadd.f32 %v531_v42, %v528_v54  ;;  %v534_v57 = vadd.f32 %v532_v5, %v529_v23 }
  0xf6   :  { %v549_v13 = vsel %vm547_vm0, %v533_v30, 0.0  ;;  %v550_v44 = vsel %vm548_vm1, %v534_v57, 0.0 }
  0xf7   :  { %v553_v33 = vrot.slane %v549_v13, 1  ;;  %v554_v34 = vrot.slane %v550_v44, 1  ;;  %v559_v40 = vadd.f32 %v549_v13, %v510_v12  ;;  %v560_v16 = vadd.f32 %v550_v44, %v511_v48 }
  0xf9   :  { %v561_v15 = vadd.f32 %v553_v33, %v512_v46  ;;  %v562_v47 = vadd.f32 %v554_v34, %v513_v62  ;;  %v655_v17 = vmul.f32 -1.442695, %v559_v40  ;;  %v656_v45 = vmul.f32 -1.442695, %v560_v16 }
  0xfb   :  { %676 = vpow2.f32 %v655_v17  ;;  %v657_v39 = vmul.f32 -1.442695, %v561_v15  ;;  %v658_v21 = vmul.f32 -1.442695, %v562_v47 }
  0xfc   :  { %678 = vpow2.f32 %v656_v45 }
  0xfd   :  { %680 = vpow2.f32 %v657_v39 }
  0xfe   :  { %682 = vpow2.f32 %v658_v21 }
 0x105   :  { %v677_v58 = vpop.eup %676 }
 0x106   :  { %v679_v27 = vpop.eup %678  ;;  %v575_v36 = vadd.f32 1.0, %v677_v58 }
 0x107   :  { %v681_v35 = vpop.eup %680  ;;  %v576_v56 = vadd.f32 1.0, %v679_v27 }
 0x108   :  { %v683_v2 = vpop.eup %682  ;;  %v577_v59 = vadd.f32 1.0, %v681_v35  ;;  %684 = vrcp.f32 %v575_v36 }
 0x109   :  { %v578_v49 = vadd.f32 1.0, %v683_v2  ;;  %686 = vrcp.f32 %v576_v56 }
 0x10a   :  { %688 = vrcp.f32 %v577_v59 }
 0x10b   :  { %690 = vrcp.f32 %v578_v49 }
 0x112   :  { %v685_v60 = vpop.eup %684 }
 0x113   :  { %v687_v50 = vpop.eup %686  ;;  %v587_v19 = vadd.f32 1.0, %v685_v60 }
 0x114   :  { %v689_v10 = vpop.eup %688  ;;  %v588_v25 = vadd.f32 1.0, %v687_v50 }
 0x115   :  { %v691_v51 = vpop.eup %690  ;;  %v589_v4 = vadd.f32 1.0, %v689_v10  ;;  %v594_v43 = vrot.slane %v587_v19, %v938_v38 }
 0x116   :  { %v590_v3 = vadd.f32 1.0, %v691_v51  ;;  %v598_v32 = vrot.slane %v588_v25, %v938_v38 }
 0x117   :  { %v602_v14 = vrot.slane %v589_v4, %v938_v38 }
 0x118   :  { %v606_v55 = vrot.slane %v590_v3, %v938_v38  ;;  %v611_v20 = vcombine.low %v594_v43, %v598_v32 }
 0x11a   :  { %v612_v37 = vcombine.low %v602_v14, %v606_v55  ;;  %v615_v52 = vmul.f32 %v611_v20, %v850_v0 }
 0x11c   :  { %v616_v53 = vmul.f32 %v612_v37, %v852_v1  ;;  %617 = vst [vmem:[#allocation9] sm:$0xff] %v615_v52 }
 0x11e   :  { %618 = vst [vmem:[#allocation9 + $0x8] sm:$0xff] %v616_v53 }
 0x11f   :  { %757 = shalt.err (!%p754_p9)
}
 0x120   :  { %s758_s21 = scalar_lea.hbm %s1343_s3, 256 }
 0x121   :  { %p759_p10 = scmp.ne.s32.totalorder %s1343_s3, %s758_s21  ;;  %p762_p11 = scmp.lt.u32.totalorder %s758_s21, %s1343_s3 }
 0x123   :  { %p764_p12 = pnand %p762_p11, %p759_p10 }
 0x125   :  { %767 = shalt.err (!%p764_p12)
}
 0x126   :  { %630 = dma.vmem_to_hbm [thread:$0]  %s625_s18, 256, %s1343_s3, [#allocation4], %s779_s1, %s779_s1, %s780_s16  }
 0x127   :  { %774 = dma.done.wait [#allocation4], 256  }
 0x128   :  { %775 = vsyncadd [#allocation4], 4294967040 }
 0x129   :  { %634 = vsyncpa [#allocation3], 1 }
 0x12a   :  { %635 = vsyncpa [#allocation8], 1 }
 0x12b   :  { %636 = vsyncpa [#allocation4], 1 }
 0x12c   :  { %637 = vsyncpa [#allocation5], 1 }

</bundles_post_ra>
